<compile_context>
chip_gen: v6e
topology: v6e:2x2x1
jax: 0.10.0
libtpu: 0.0.40
codegen_flags: <defaults>
</compile_context>

<pallas_src>
import functools

import jax
import jax.numpy as jnp
from jax.experimental import pallas as pl
from jax.experimental.pallas import tpu as pltpu


def _mlp_decoder_kernel(x_ref, w1_ref, b1_ref, w2_ref, b2_ref, o_ref):
    """One row-tile of the MLP decoder.

    x_ref : (TM, in_p)     bf16 tile of input rows
    w1_ref: (in_p, hid_p)  bf16 first-layer weight (resident)
    b1_ref: (1, hid_p)     f32 first-layer bias
    w2_ref: (hid_p, out_p) bf16 second-layer weight (resident)
    b2_ref: (1, out_p)     f32 second-layer bias
    o_ref : (TM, out_p)    output tile (x.dtype)
    """
    # Linear 1: bf16 operands straight into the MXU, f32 accumulation.
    h = jnp.dot(x_ref[...], w1_ref[...], preferred_element_type=jnp.float32)
    h = h + b1_ref[...]

    # LeakyReLU (PyTorch default negative_slope = 0.01).
    h = jnp.where(h > 0, h, 0.01 * h)

    # Single down-cast of the (TM, hidden) intermediate for the second MXU pass.
    h = h.astype(jnp.bfloat16)

    # Linear 2: bf16 operands, f32 accumulation, f32 bias.
    y = jnp.dot(h, w2_ref[...], preferred_element_type=jnp.float32) + b2_ref[...]

    # Sigmoid: exp on the EUP, approximate reciprocal also on the EUP
    # (frees VPU slots vs. a divide sequence).
    o_ref[...] = pl.reciprocal(1.0 + jnp.exp(-y), approx=True).astype(o_ref.dtype)


def _round_up(x, m):
    return pl.cdiv(x, m) * m


@functools.partial(jax.jit, static_argnames=("tile_m",))
def mlp_decoder(x, w1, b1, w2, b2, *, tile_m=256):
    """Apply the MLPDecoder forward pass.

    x: (..., in_features)  -> returns (..., final_features)
    w1: (in_features, hidden_features), b1: (hidden_features,)
    w2: (hidden_features, final_features), b2: (final_features,)
    """
    in_features, hidden_features = w1.shape
    final_features = w2.shape[1]

    lead_shape = x.shape[:-1]
    x2 = x.reshape(-1, in_features)
    m = x2.shape[0]

    # Lane-dense (multiple-of-128) feature padding.
    in_p = _round_up(in_features, 128)
    hid_p = _round_up(hidden_features, 128)
    out_p = _round_up(final_features, 128)

    # Row tile: multiple of 16 (bf16 sublane packing), clamped to problem size.
    tm = min(tile_m, _round_up(m, 16))
    m_p = _round_up(m, tm)

    # Pad once on the host/XLA side, cast matmul operands to bf16 once.
    x2p = jnp.pad(x2, ((0, m_p - m), (0, in_p - in_features))).astype(jnp.bfloat16)
    w1p = jnp.pad(w1, ((0, in_p - in_features),
                       (0, hid_p - hidden_features))).astype(jnp.bfloat16)
    w2p = jnp.pad(w2, ((0, hid_p - hidden_features),
                       (0, out_p - final_features))).astype(jnp.bfloat16)
    b1p = jnp.pad(b1.reshape(1, hidden_features),
                  ((0, 0), (0, hid_p - hidden_features))).astype(jnp.float32)
    b2p = jnp.pad(b2.reshape(1, final_features),
                  ((0, 0), (0, out_p - final_features))).astype(jnp.float32)

    grid = (m_p // tm,)

    out = pl.pallas_call(
        _mlp_decoder_kernel,
        out_shape=jax.ShapeDtypeStruct((m_p, out_p), x.dtype),
        grid_spec=pltpu.PrefetchScalarGridSpec(
            num_scalar_prefetch=0,
            grid=grid,
            in_specs=[
                # row tile of the input
                pl.BlockSpec((tm, in_p), lambda i: (i, 0)),
                # full weights / biases, constant index_map -> resident
                pl.BlockSpec((in_p, hid_p), lambda i: (0, 0)),
                pl.BlockSpec((1, hid_p), lambda i: (0, 0)),
                pl.BlockSpec((hid_p, out_p), lambda i: (0, 0)),
                pl.BlockSpec((1, out_p), lambda i: (0, 0)),
            ],
            out_specs=pl.BlockSpec((tm, out_p), lambda i: (i, 0)),
        ),
        compiler_params=pltpu.CompilerParams(
            dimension_semantics=("parallel",),
            vmem_limit_bytes=32 * 1024 * 1024,
        ),
    )(x2p, w1p, b1p, w2p, b2p)

    out = out[:m, :final_features]
    return out.reshape(*lead_shape, final_features)


def init_mlp_decoder_params(key, in_features, hidden_features, final_features,
                            dtype=jnp.float32):
    """Deterministic PyTorch-style (Kaiming-uniform-ish) init of the two Linears."""
    k1, k2, k3, k4 = jax.random.split(key, 4)
    bound1 = 1.0 / jnp.sqrt(in_features)
    bound2 = 1.0 / jnp.sqrt(hidden_features)
    w1 = jax.random.uniform(k1, (in_features, hidden_features),
                            minval=-bound1, maxval=bound1, dtype=dtype)
    b1 = jax.random.uniform(k2, (hidden_features,),
                            minval=-bound1, maxval=bound1, dtype=dtype)
    w2 = jax.random.uniform(k3, (hidden_features, final_features),
                            minval=-bound2, maxval=bound2, dtype=dtype)
    b2 = jax.random.uniform(k4, (final_features,),
                            minval=-bound2, maxval=bound2, dtype=dtype)
    return w1, b1, w2, b2


def _reference(x, w1, b1, w2, b2):
    h = x @ w1 + b1
    h = jnp.where(h > 0, h, 0.01 * h)
    y = h @ w2 + b2
    return jax.nn.sigmoid(y)


if __name__ == "__main__":
    # Small shapes consistent with MLPDecoder(in=50, hidden=1024, final=202),
    # scaled down: in=50, hidden=128, final=72 (exercises the 128-padding of
    # both the K and output axes).
    in_features, hidden_features, final_features = 50, 128, 72
    batch, seq = 2, 8

    key = jax.random.PRNGKey(0)
    kx, kp, kx2 = jax.random.split(key, 3)
    x = jax.random.normal(kx, (batch, seq, in_features), dtype=jnp.float32)
    w1, b1, w2, b2 = init_mlp_decoder_params(
        kp, in_features, hidden_features, final_features)

    # Default tiling (tile_m clamps to the tiny problem).
    out = mlp_decoder(x, w1, b1, w2, b2)
    out = jax.block_until_ready(out)
    ref = _reference(x, w1, b1, w2, b2)
    assert out.shape == (batch, seq, final_features), out.shape
    # bf16 MXU operands with f32 accumulation: compare with a loose tolerance.
    assert jnp.allclose(out, ref, atol=2e-2, rtol=0.0), "mismatch vs reference"

    # Second check: enough rows (plus row padding) to exercise a multi-step grid.
    xb = jax.random.normal(kx2, (4, 72, in_features), dtype=jnp.float32)
    out_b = mlp_decoder(xb, w1, b1, w2, b2, tile_m=128)
    out_b = jax.block_until_ready(out_b)
    ref_b = _reference(xb, w1, b1, w2, b2)
    assert out_b.shape == (4, 72, final_features), out_b.shape
    assert jnp.allclose(out_b, ref_b, atol=2e-2, rtol=0.0), "mismatch (tiled) vs reference"

    print("KERNEL_OK")
</pallas_src>

<mosaic_0001>
module attributes {stable_mosaic.version = 11 : i64} {
  func.func @_mlp_decoder_kernel(%arg0: i32, %arg1: memref<16x128xbf16, #tpu.memory_space<vmem>>, %arg2: memref<128x128xbf16, #tpu.memory_space<vmem>>, %arg3: memref<1x128xf32, #tpu.memory_space<vmem>>, %arg4: memref<128x128xbf16, #tpu.memory_space<vmem>>, %arg5: memref<1x128xf32, #tpu.memory_space<vmem>>, %arg6: memref<16x128xf32, #tpu.memory_space<vmem>>) attributes {dimension_semantics = [#tpu.dimension_semantics<parallel>], iteration_bounds = array<i64: 1>, scalar_prefetch = 0 : i64, scratch_operands = 0 : i64, tpu.core_type = #tpu.core_type<tc>, window_params = [{transform_indices = @transform_0, window_bounds = array<i64: 16, 128>}, {pipeline_mode = #tpu.pipeline_mode<synchronous>, transform_indices = @transform_1, window_bounds = array<i64: 128, 128>}, {pipeline_mode = #tpu.pipeline_mode<synchronous>, transform_indices = @transform_2, window_bounds = array<i64: 1, 128>}, {pipeline_mode = #tpu.pipeline_mode<synchronous>, transform_indices = @transform_3, window_bounds = array<i64: 128, 128>}, {pipeline_mode = #tpu.pipeline_mode<synchronous>, transform_indices = @transform_4, window_bounds = array<i64: 1, 128>}, {transform_indices = @transform_5, window_bounds = array<i64: 16, 128>}]} {
    %c0 = arith.constant 0 : index
    %c0_0 = arith.constant 0 : index
    %0 = vector.load %arg1[%c0, %c0_0] : memref<16x128xbf16, #tpu.memory_space<vmem>>, vector<16x128xbf16>
    %c0_1 = arith.constant 0 : index
    %c0_2 = arith.constant 0 : index
    %1 = vector.load %arg2[%c0_1, %c0_2] : memref<128x128xbf16, #tpu.memory_space<vmem>>, vector<128x128xbf16>
    %cst = arith.constant dense<0.000000e+00> : vector<16x128xf32>
    %2 = tpu.matmul %0, %1, %cst {dimension_numbers = #tpu.dot_dimension_numbers<[1], [0], [0], [1], [0, 0, 1, 1], [], []>} : vector<16x128xbf16>, vector<128x128xbf16>, vector<16x128xf32> -> vector<16x128xf32>
    %c0_3 = arith.constant 0 : index
    %c0_4 = arith.constant 0 : index
    %3 = vector.load %arg3[%c0_3, %c0_4] : memref<1x128xf32, #tpu.memory_space<vmem>>, vector<1x128xf32>
    %4 = vector.broadcast %3 : vector<1x128xf32> to vector<16x128xf32>
    %5 = arith.addf %2, %4 : vector<16x128xf32>
    %cst_5 = arith.constant 0.000000e+00 : f32
    %6 = vector.broadcast %cst_5 : f32 to vector<16x128xf32>
    %7 = arith.cmpf ogt, %5, %6 : vector<16x128xf32>
    %cst_6 = arith.constant 0.00999999977 : f32
    %8 = vector.broadcast %cst_6 : f32 to vector<16x128xf32>
    %9 = arith.mulf %8, %5 : vector<16x128xf32>
    %10 = arith.select %7, %5, %9 : vector<16x128xi1>, vector<16x128xf32>
    %11 = arith.truncf %10 : vector<16x128xf32> to vector<16x128xbf16>
    %c0_7 = arith.constant 0 : index
    %c0_8 = arith.constant 0 : index
    %12 = vector.load %arg4[%c0_7, %c0_8] : memref<128x128xbf16, #tpu.memory_space<vmem>>, vector<128x128xbf16>
    %cst_9 = arith.constant dense<0.000000e+00> : vector<16x128xf32>
    %13 = tpu.matmul %11, %12, %cst_9 {dimension_numbers = #tpu.dot_dimension_numbers<[1], [0], [0], [1], [0, 0, 1, 1], [], []>} : vector<16x128xbf16>, vector<128x128xbf16>, vector<16x128xf32> -> vector<16x128xf32>
    %c0_10 = arith.constant 0 : index
    %c0_11 = arith.constant 0 : index
    %14 = vector.load %arg5[%c0_10, %c0_11] : memref<1x128xf32, #tpu.memory_space<vmem>>, vector<1x128xf32>
    %15 = vector.broadcast %14 : vector<1x128xf32> to vector<16x128xf32>
    %16 = arith.addf %13, %15 : vector<16x128xf32>
    %cst_12 = arith.constant 0.000000e+00 : f32
    %17 = vector.broadcast %cst_12 : f32 to vector<16x128xf32>
    %18 = arith.subf %17, %16 : vector<16x128xf32>
    %19 = math.exp %18 : vector<16x128xf32>
    %cst_13 = arith.constant 1.000000e+00 : f32
    %20 = vector.broadcast %cst_13 : f32 to vector<16x128xf32>
    %21 = arith.addf %20, %19 : vector<16x128xf32>
    %22 = tpu.reciprocal %21 {approx = true} : vector<16x128xf32> -> vector<16x128xf32>
    %c0_14 = arith.constant 0 : index
    %c0_15 = arith.constant 0 : index
    %23 = vector.load %arg6[%c0_14, %c0_15] : memref<16x128xf32, #tpu.memory_space<vmem>>, vector<16x128xf32>
    tpu.vector_store %arg6[%c0_14, %c0_15], %22 {strides = array<i32>} : memref<16x128xf32, #tpu.memory_space<vmem>>, vector<16x128xf32>,
    return
  }
  func.func @transform_0(%arg0: i32) -> (i32, i32) {
    %c0_i32 = arith.constant 0 : i32
    %c0_i32_0 = arith.constant 0 : i32
    return %arg0, %c0_i32 : i32, i32
  }
  func.func @transform_1(%arg0: i32) -> (i32, i32) {
    %c0_i32 = arith.constant 0 : i32
    %c0_i32_0 = arith.constant 0 : i32
    %c0_i32_1 = arith.constant 0 : i32
    return %c0_i32, %c0_i32_0 : i32, i32
  }
  func.func @transform_2(%arg0: i32) -> (i32, i32) {
    %c0_i32 = arith.constant 0 : i32
    %c0_i32_0 = arith.constant 0 : i32
    %c0_i32_1 = arith.constant 0 : i32
    return %c0_i32, %c0_i32_0 : i32, i32
  }
  func.func @transform_3(%arg0: i32) -> (i32, i32) {
    %c0_i32 = arith.constant 0 : i32
    %c0_i32_0 = arith.constant 0 : i32
    %c0_i32_1 = arith.constant 0 : i32
    return %c0_i32, %c0_i32_0 : i32, i32
  }
  func.func @transform_4(%arg0: i32) -> (i32, i32) {
    %c0_i32 = arith.constant 0 : i32
    %c0_i32_0 = arith.constant 0 : i32
    %c0_i32_1 = arith.constant 0 : i32
    return %c0_i32, %c0_i32_0 : i32, i32
  }
  func.func @transform_5(%arg0: i32) -> (i32, i32) {
    %c0_i32 = arith.constant 0 : i32
    %c0_i32_0 = arith.constant 0 : i32
    return %arg0, %c0_i32 : i32, i32
  }
}

</mosaic_0001>

<bundles_post_ra>
// kernel: mlp_decoder.1
= control target key start
LH: loop header
LB: loop body
LE: loop exit
PB: predicated region body
PF: predicated region fallthrough
CT: control target
= control target key end

     0   :  { %v380_v0 = vmov 0.0   ;;  %vm381_vm0 = vmmov 0   ;;  %s475_s1 = inlined_call_operand.vmem [shape: bf16[128,128], index: 1, kind: input, shape index: {}]   ;;  %s476_s3 = inlined_call_operand.vmem [shape: bf16[128,128], index: 3, kind: input, shape index: {}]   ;;  %s477_s0 = inlined_call_operand.vmem [shape: bf16[16,128], index: 0, kind: input, shape index: {}]   ;;  %s478_s2 = inlined_call_operand.vmem [shape: f32[1,128], index: 2, kind: input, shape index: {}]   ;;  %s479_s4 = inlined_call_operand.vmem [shape: f32[1,128], index: 4, kind: input, shape index: {}]   ;;  %s480_s5 = inlined_call_operand.vmem [shape: f32[16,128], index: 5, kind: output, shape index: {}]  }
   0x1   :  { %313 = vmatprep.subr.bf16.mxu0 %v380_v0  ;;  %v355_v1 = vld [vmem:[%s475_s1 + $0x38] sm:$0xff]   ;;  %329 = vmatprep.mubr.msk.bf16.mxu0 %vm381_vm0, %v380_v0  ;;  %v356_v2 = vld [vmem:[%s475_s1 + $0x30] sm:$0xff]   ;;  %v357_v3 = vld [vmem:[%s475_s1 + $0x28] sm:$0xff]  }
   0x2   :  { %333 = vmatprep.subr.bf16.mxu1 %v380_v0  ;;  %349 = vmatprep.mubr.msk.bf16.mxu1 %vm381_vm0, %v380_v0  ;;  %v364_v4 = vld [vmem:[%s476_s3 + $0x38] sm:$0xff]   ;;  %v358_v5 = vld [vmem:[%s475_s1 + $0x20] sm:$0xff]   ;;  %v365_v6 = vld [vmem:[%s476_s3 + $0x30] sm:$0xff]  }
   0x3   :  { %314 = vmatpush3.bf16.msra.mxu0 %v355_v1  ;;  %334 = vmatpush3.bf16.msra.mxu1 %v364_v4  ;;  %v359_v7 = vld [vmem:[%s475_s1 + $0x18] sm:$0xff]   ;;  %v366_v8 = vld [vmem:[%s476_s3 + $0x28] sm:$0xff]   ;;  %v360_v9 = vld [vmem:[%s475_s1 + $0x10] sm:$0xff]  }
   0x4   :  { %315 = vmatprep.subr.bf16.mxu0 %v380_v0  ;;  %335 = vmatprep.subr.bf16.mxu1 %v380_v0  ;;  %v367_v10 = vld [vmem:[%s476_s3 + $0x20] sm:$0xff]   ;;  %v361_v11 = vld [vmem:[%s475_s1 + $0x8] sm:$0xff]   ;;  %v368_v12 = vld [vmem:[%s476_s3 + $0x18] sm:$0xff]  }
   0x5   :  { %v362_v13 = vld [vmem:[%s475_s1] sm:$0xff]   ;;  %v369_v15 = vld [vmem:[%s476_s3 + $0x10] sm:$0xff]   ;;  %v370_v16 = vld [vmem:[%s476_s3 + $0x8] sm:$0xff]  }
   0x6   :  { %v363_v14 = vld [vmem:[%s477_s0] sm:$0xff]  }
   0x7   :  { %316 = vmatpush3.bf16.msra.mxu0 %v356_v2  ;;  %336 = vmatpush3.bf16.msra.mxu1 %v365_v6  ;;  %v371_v17 = vld [vmem:[%s476_s3] sm:$0xff]  }
   0x8   :  { %317 = vmatprep.subr.bf16.mxu0 %v380_v0  ;;  %337 = vmatprep.subr.bf16.mxu1 %v380_v0  ;;  %v276_v18 = vld [vmem:[%s478_s2] ss:$0 sm:$0xff] }
   0x9   :  { %v286_v30 = vld [vmem:[%s479_s4] ss:$0 sm:$0xff] }
   0xb   :  { %318 = vmatpush3.bf16.msra.mxu0 %v357_v3  ;;  %338 = vmatpush3.bf16.msra.mxu1 %v366_v8 }
   0xc   :  { %319 = vmatprep.subr.bf16.mxu0 %v380_v0  ;;  %339 = vmatprep.subr.bf16.mxu1 %v380_v0 }
   0xf   :  { %320 = vmatpush3.bf16.msra.mxu0 %v358_v5  ;;  %340 = vmatpush3.bf16.msra.mxu1 %v367_v10 }
  0x10   :  { %321 = vmatprep.subr.bf16.mxu0 %v380_v0  ;;  %341 = vmatprep.subr.bf16.mxu1 %v380_v0 }
  0x13   :  { %322 = vmatpush3.bf16.msra.mxu0 %v359_v7  ;;  %342 = vmatpush3.bf16.msra.mxu1 %v368_v12 }
  0x14   :  { %323 = vmatprep.subr.bf16.mxu0 %v380_v0  ;;  %343 = vmatprep.subr.bf16.mxu1 %v380_v0 }
  0x17   :  { %324 = vmatpush3.bf16.msra.mxu0 %v360_v9  ;;  %344 = vmatpush3.bf16.msra.mxu1 %v369_v15 }
  0x18   :  { %325 = vmatprep.subr.bf16.mxu0 %v380_v0  ;;  %345 = vmatprep.subr.bf16.mxu1 %v380_v0 }
  0x1b   :  { %326 = vmatpush3.bf16.msra.mxu0 %v361_v11  ;;  %346 = vmatpush3.bf16.msra.mxu1 %v370_v16 }
  0x1c   :  { %327 = vmatprep.subr.bf16.mxu0 %v380_v0  ;;  %347 = vmatprep.subr.bf16.mxu1 %v380_v0 }
  0x1f   :  { %328 = vmatpush3.bf16.msra.mxu0 %v362_v13  ;;  %348 = vmatpush3.bf16.msra.mxu1 %v371_v17 }
  0x22   :  { %330 = vmatmul.mubr.bf16.vlgmr.msra.gmra.mxu0 %v363_v14 }
  0xe2   :  { %v134_v19 = vpop.f32.mrf.mxu0 }
  0xe3   :  { %v135_v20 = vadd.f32 %v276_v18, %v134_v19 }
  0xe4   :  { %v331_v21 = vpop.f32.mrf.mxu0 }
  0xe5   :  { %v143_v23 = vmul.f32 0.01, %v135_v20  ;;  %vm141_vm1 = vcmp.gt.f32.partialorder %v135_v20, 0.0 }
  0xe6   :  { %v137_v22 = vpop.f32.mrf.mxu0 }
  0xe7   :  { %v138_v24 = vadd.f32 %v276_v18, %v137_v22  ;;  %v145_v27 = vsel %vm141_vm1, %v135_v20, %v143_v23 }
  0xe8   :  { %v332_v25 = vpop.f32.mrf.mxu0 }
  0xe9   :  { %vm142_vm2 = vcmp.gt.f32.partialorder %v138_v24, 0.0  ;;  %v144_v26 = vmul.f32 0.01, %v138_v24 }
  0xeb   :  { %v146_v28 = vsel %vm142_vm2, %v138_v24, %v144_v26 }
  0xec   :  { %v147_v29 = vpack.c.bf16 %v146_v28, %v145_v27 }
  0xee   :  { %350 = vmatmul.mubr.bf16.vlgmr.msra.gmra.mxu1 %v147_v29 }
 0x1ae   :  { %v253_v31 = vpop.f32.mrf.mxu1 }
 0x1af   :  { %v254_v32 = vadd.f32 %v286_v30, %v253_v31 }
 0x1b0   :  { %v351_v33 = vpop.f32.mrf.mxu1 }
 0x1b1   :  { %v260_v34 = vsub.f32 0.0, %v254_v32 }
 0x1b2   :  { %v256_v35 = vpop.f32.mrf.mxu1 }
 0x1b3   :  { %v262_v36 = vmul.f32 1.442695, %v260_v34  ;;  %v257_v37 = vadd.f32 %v286_v30, %v256_v35 }
 0x1b4   :  { %v352_v38 = vpop.f32.mrf.mxu1 }
 0x1b5   :  { %372 = vpow2.f32 %v262_v36  ;;  %v261_v39 = vsub.f32 0.0, %v257_v37 }
 0x1b7   :  { %v264_v40 = vmul.f32 1.442695, %v261_v39 }
 0x1b9   :  { %374 = vpow2.f32 %v264_v40 }
 0x1c2   :  { %v373_v41 = vpop.eup %372 }
 0x1c3   :  { %v266_v42 = vadd.f32 1.0, %v373_v41 }
 0x1c5   :  { %376 = vrcp.f32 %v266_v42 }
 0x1c6   :  { %v375_v43 = vpop.eup %374 }
 0x1c7   :  { %v267_v44 = vadd.f32 1.0, %v375_v43 }
 0x1c9   :  { %378 = vrcp.f32 %v267_v44 }
 0x1d2   :  { %v377_v45 = vpop.eup %376 }
 0x1d3   :  { %270 = vst [vmem:[%s480_s5] sm:$0xff] %v377_v45 }
 0x1d6   :  { %v379_v46 = vpop.eup %378 }
 0x1d7   :  { %271 = vst [vmem:[%s480_s5 + $0x8] sm:$0xff] %v379_v46 }

</bundles_post_ra>
